<compile_context>
chip_gen: v7x
topology: tpu7x:2x2x1
jax: 0.10.0
libtpu: 0.0.40
codegen_flags: <defaults>
</compile_context>

<pallas_src>
import jax
import jax.numpy as jnp
from jax.experimental import pallas as pl
from jax.experimental.pallas import tpu as pltpu

GIN_EPS = 0.0            # dgl GINConv init_eps default (learn_eps=False)
LANE = 128               # pad feature dims to the 128-lane vreg width
_VMEM_LIMIT = 32 * 1024 * 1024   # safe on v5e/v6e/v7x; >> actual use at max tiles (~8 MiB)


def _round_up(n, m):
    return ((n + m - 1) // m) * m


def _choose_tiles(n_pad):
    """Row tile tm and reduction tile tk, both dividing n_pad (a multiple of 256).

    tk is the big one (adj_eff streaming is the HBM-bound leg); tm capped at 512 and at
    n_pad//2 so there are >=2 row blocks for megacore sharding when possible.
    """
    tm_cap = min(512, max(128, n_pad // 2))
    tm = next(t for t in (512, 256, 128) if t <= tm_cap and n_pad % t == 0)
    tk = next(t for t in (2048, 1024, 512, 256, 128) if t <= n_pad and n_pad % t == 0)
    return tm, tk


def _pad2(a, rows, cols, dtype):
    out = jnp.zeros((rows, cols), dtype)
    return out.at[: a.shape[0], : a.shape[1]].set(a.astype(dtype))


# ---------------------------------------------------------------------------
# GINConv layer: grid = (n_pad // tm rows, n_pad // tk adjacency columns)
# adj_eff already contains 1/in_degree scaling AND the (1+eps)*I self term.
# ---------------------------------------------------------------------------
def _gin_layer_kernel(adj_ref, hk_ref, w_ref, b_ref, out_ref, acc_ref):
    k = pl.program_id(1)

    @pl.when(k == 0)
    def _():
        acc_ref[...] = jnp.zeros_like(acc_ref)

    # aggregation + self term in one MXU matmul (adj_eff = adj_mean + (1+eps)*I)
    acc_ref[...] += jnp.dot(adj_ref[...], hk_ref[...],
                            preferred_element_type=jnp.float32)

    @pl.when(k == pl.num_programs(1) - 1)
    def _():
        y = jnp.dot(acc_ref[...].astype(jnp.bfloat16), w_ref[...],
                    preferred_element_type=jnp.float32) + b_ref[...]
        out_ref[...] = jnp.maximum(y, 0.0).astype(out_ref.dtype)


# Second GIN layer with the 2-layer MLP head fused into the finalize epilogue.
def _gin_layer_mlp_kernel(adj_ref, hk_ref, w_ref, b_ref,
                          wm0_ref, bm0_ref, wm1_ref, bm1_ref, out_ref, acc_ref):
    k = pl.program_id(1)

    @pl.when(k == 0)
    def _():
        acc_ref[...] = jnp.zeros_like(acc_ref)

    acc_ref[...] += jnp.dot(adj_ref[...], hk_ref[...],
                            preferred_element_type=jnp.float32)

    @pl.when(k == pl.num_programs(1) - 1)
    def _():
        # GIN layer-2 apply_func + ReLU
        z = jnp.dot(acc_ref[...].astype(jnp.bfloat16), w_ref[...],
                    preferred_element_type=jnp.float32) + b_ref[...]
        h2 = jnp.maximum(z, 0.0).astype(jnp.bfloat16)
        # MLP head: relu(h2 @ Wm0 + bm0) @ Wm1 + bm1   (no activation on last layer)
        z1 = jnp.dot(h2, wm0_ref[...], preferred_element_type=jnp.float32) + bm0_ref[...]
        h3 = jnp.maximum(z1, 0.0).astype(jnp.bfloat16)
        y = jnp.dot(h3, wm1_ref[...], preferred_element_type=jnp.float32) + bm1_ref[...]
        out_ref[...] = y.astype(out_ref.dtype)


def gin_layer(adj_eff, h, w, b, *, tm, tk):
    n_pad, F = h.shape
    H = w.shape[1]
    return pl.pallas_call(
        _gin_layer_kernel,
        out_shape=jax.ShapeDtypeStruct((n_pad, H), jnp.bfloat16),
        grid=(n_pad // tm, n_pad // tk),
        in_specs=[
            pl.BlockSpec((tm, tk), lambda i, k: (i, k)),   # adj_eff tile (dominant HBM stream)
            pl.BlockSpec((tk, F), lambda i, k: (k, 0)),    # h rows being reduced over
            pl.BlockSpec((F, H), lambda i, k: (0, 0)),     # W  (VMEM resident)
            pl.BlockSpec((1, H), lambda i, k: (0, 0)),     # b  (VMEM resident)
        ],
        out_specs=pl.BlockSpec((tm, H), lambda i, k: (i, 0)),
        scratch_shapes=[pltpu.VMEM((tm, H), jnp.float32)],
        compiler_params=pltpu.CompilerParams(
            dimension_semantics=("parallel", "arbitrary"),
            vmem_limit_bytes=_VMEM_LIMIT),
    )(adj_eff, h, w, b)


def gin_layer_fused_mlp(adj_eff, h, w, b, wm0, bm0, wm1, bm1, *, tm, tk):
    n_pad, F = h.shape
    H = w.shape[1]
    C = wm1.shape[1]
    return pl.pallas_call(
        _gin_layer_mlp_kernel,
        out_shape=jax.ShapeDtypeStruct((n_pad, C), jnp.bfloat16),
        grid=(n_pad // tm, n_pad // tk),
        in_specs=[
            pl.BlockSpec((tm, tk), lambda i, k: (i, k)),   # adj_eff tile
            pl.BlockSpec((tk, F), lambda i, k: (k, 0)),    # h rows being reduced over
            pl.BlockSpec((F, H), lambda i, k: (0, 0)),     # W   (resident)
            pl.BlockSpec((1, H), lambda i, k: (0, 0)),     # b   (resident)
            pl.BlockSpec((H, H), lambda i, k: (0, 0)),     # Wm0 (resident)
            pl.BlockSpec((1, H), lambda i, k: (0, 0)),     # bm0 (resident)
            pl.BlockSpec((H, C), lambda i, k: (0, 0)),     # Wm1 (resident)
            pl.BlockSpec((1, C), lambda i, k: (0, 0)),     # bm1 (resident)
        ],
        out_specs=pl.BlockSpec((tm, C), lambda i, k: (i, 0)),
        scratch_shapes=[pltpu.VMEM((tm, H), jnp.float32)],
        compiler_params=pltpu.CompilerParams(
            dimension_semantics=("parallel", "arbitrary"),
            vmem_limit_bytes=_VMEM_LIMIT),
    )(adj_eff, h, w, b, wm0, bm0, wm1, bm1)


# ---------------------------------------------------------------------------
# One-time per-graph / per-model preprocessing (hoisted out of the forward pass)
# ---------------------------------------------------------------------------
def preprocess_graph(adj, eps=GIN_EPS):
    """adj_eff = row-normalized adjacency (mean aggregation) + (1+eps)*I, padded, bf16.

    Assumes symmetric adjacency (adj.T == adj); for a directed graph pass adj.T.
    Exact for eps=0 and no self-loops (diagonal is exactly 1.0 in bf16).
    """
    N = adj.shape[0]
    n_pad = _round_up(N, 256)
    in_deg = jnp.maximum(adj.sum(axis=0), 1.0)
    adj_eff = adj * (1.0 / in_deg)[:, None] + (1.0 + eps) * jnp.eye(N, dtype=adj.dtype)
    out = jnp.zeros((n_pad, n_pad), jnp.bfloat16)
    return out.at[:N, :N].set(adj_eff.astype(jnp.bfloat16))


def preprocess_params(params):
    """Pad feature dims to 128 lanes, cast matmul operands to bf16, biases stay f32."""
    FP = HP = CP = LANE
    return {
        "h_feats": params["conv_w"][0].shape[1],
        "num_classes": params["mlp_w"][1].shape[1],
        "w0": _pad2(params["conv_w"][0], FP, HP, jnp.bfloat16),
        "b0": _pad2(params["conv_b"][0].reshape(1, -1), 1, HP, jnp.float32),
        "w1": _pad2(params["conv_w"][1], HP, HP, jnp.bfloat16),
        "b1": _pad2(params["conv_b"][1].reshape(1, -1), 1, HP, jnp.float32),
        "wm0": _pad2(params["mlp_w"][0], HP, HP, jnp.bfloat16),
        "bm0": _pad2(params["mlp_b"][0].reshape(1, -1), 1, HP, jnp.float32),
        "wm1": _pad2(params["mlp_w"][1], HP, CP, jnp.bfloat16),
        "bm1": _pad2(params["mlp_b"][1].reshape(1, -1), 1, CP, jnp.float32),
    }


# ---------------------------------------------------------------------------
# Wrapper: DCI_Encoder.forward
# ---------------------------------------------------------------------------
def dci_encoder_forward(x, adj_eff, pp, *, corrupt=False, use_mlp=False, key=None):
    N = x.shape[0]
    n_pad = adj_eff.shape[0]

    if corrupt:
        # torch.randperm node-feature shuffle, done as input prep (not a kernel op)
        x = x[jax.random.permutation(key, N)]

    h = _pad2(x, n_pad, LANE, jnp.bfloat16)
    tm, tk = _choose_tiles(n_pad)

    h = gin_layer(adj_eff, h, pp["w0"], pp["b0"], tm=tm, tk=tk)        # GINConv layer 0

    if use_mlp:
        out = gin_layer_fused_mlp(adj_eff, h, pp["w1"], pp["b1"],      # GINConv layer 1
                                  pp["wm0"], pp["bm0"],                #  + fused MLP head
                                  pp["wm1"], pp["bm1"], tm=tm, tk=tk)
        return out[:N, :pp["num_classes"]].astype(jnp.float32)

    h = gin_layer(adj_eff, h, pp["w1"], pp["b1"], tm=tm, tk=tk)        # GINConv layer 1
    return h[:N, :pp["h_feats"]].astype(jnp.float32)


# ---------------------------------------------------------------------------
# Pure-JAX f32 reference
# ---------------------------------------------------------------------------
def dci_encoder_reference(x, adj, params, *, use_mlp=False):
    in_deg = jnp.maximum(adj.sum(axis=0), 1.0)
    adj_mean = adj * (1.0 / in_deg)[:, None]          # symmetric adjacency
    h = x
    for w, b in zip(params["conv_w"], params["conv_b"]):
        h = jnp.maximum(((1.0 + GIN_EPS) * h + adj_mean @ h) @ w + b, 0.0)
    if use_mlp:
        (w1, w2), (b1, b2) = params["mlp_w"], params["mlp_b"]
        h = jnp.maximum(h @ w1 + b1, 0.0) @ w2 + b2
    return h


if __name__ == "__main__":
    # small deterministic problem: N=256 nodes, in_feats=16, h_feats=32, num_classes=2
    N, F_IN, H_FEATS, NUM_CLASSES = 256, 16, 32, 2
    key = jax.random.PRNGKey(0)
    k_x, k_a, k_perm, *wk = jax.random.split(key, 12)

    x = jax.random.normal(k_x, (N, F_IN), dtype=jnp.float32)

    # deterministic undirected adjacency, no self-loops
    a = (jax.random.uniform(k_a, (N, N)) < 0.3).astype(jnp.float32)
    adj = jnp.maximum(a, a.T) * (1.0 - jnp.eye(N, dtype=jnp.float32))

    def linear_init(kw, kb, fan_in, fan_out):
        s = 1.0 / (fan_in ** 0.5)
        w = ((jax.random.uniform(kw, (fan_in, fan_out)) * 2.0 - 1.0) * s).astype(jnp.float32)
        b = ((jax.random.uniform(kb, (fan_out,)) * 2.0 - 1.0) * s).astype(jnp.float32)
        return w, b

    w0, b0 = linear_init(wk[0], wk[1], F_IN, H_FEATS)            # GINConv 0 apply_func
    w1, b1 = linear_init(wk[2], wk[3], H_FEATS, H_FEATS)         # GINConv 1 apply_func
    wm0, bm0 = linear_init(wk[4], wk[5], H_FEATS, H_FEATS)       # MLP layer 0
    wm1, bm1 = linear_init(wk[6], wk[7], H_FEATS, NUM_CLASSES)   # MLP layer 1

    params = {"conv_w": [w0, w1], "conv_b": [b0, b1],
              "mlp_w": [wm0, wm1], "mlp_b": [bm0, bm1]}

    # one-time preprocessing (hoisted out of the forward pass, reused across calls)
    adj_eff = preprocess_graph(adj)
    pp = preprocess_params(params)

    # default forward path: encoder only (corrupt=False, use_mlp=False)
    out = jax.block_until_ready(dci_encoder_forward(x, adj_eff, pp))
    ref = dci_encoder_reference(x, adj, params)
    assert out.shape == (N, H_FEATS)
    # bf16 operands (f32 accumulation) -> loosened tolerance vs f32 reference;
    # dominant error source is the bf16 1/deg entries of adj_eff.
    assert jnp.allclose(out, ref, atol=5e-2, rtol=5e-2), "GIN encoder mismatch vs reference"

    # use_mlp=True path (classifier head fused into layer-2 finalize)
    out2 = jax.block_until_ready(dci_encoder_forward(x, adj_eff, pp, use_mlp=True))
    ref2 = dci_encoder_reference(x, adj, params, use_mlp=True)
    assert out2.shape == (N, NUM_CLASSES)
    assert jnp.allclose(out2, ref2, atol=5e-2, rtol=5e-2), "MLP head mismatch vs reference"

    # corrupt=True path (node-feature permutation) — shape/compile smoke test
    out3 = jax.block_until_ready(
        dci_encoder_forward(x, adj_eff, pp, corrupt=True, key=k_perm))
    assert out3.shape == (N, H_FEATS)

    print("KERNEL_OK")
</pallas_src>

<mosaic_0001>
module attributes {stable_mosaic.version = 11 : i64} {
  func.func @_gin_layer_kernel(%arg0: i32, %arg1: i32, %arg2: memref<128x256xbf16, #tpu.memory_space<vmem>>, %arg3: memref<256x128xbf16, #tpu.memory_space<vmem>>, %arg4: memref<128x128xbf16, #tpu.memory_space<vmem>>, %arg5: memref<1x128xf32, #tpu.memory_space<vmem>>, %arg6: memref<128x128xbf16, #tpu.memory_space<vmem>>, %arg7: memref<128x128xf32, #tpu.memory_space<vmem>>) attributes {dimension_semantics = [#tpu.dimension_semantics<parallel>, #tpu.dimension_semantics<arbitrary>], iteration_bounds = array<i64: 2, 1>, scalar_prefetch = 0 : i64, scratch_operands = 1 : i64, tpu.core_type = #tpu.core_type<tc>, window_params = [{transform_indices = @transform_0, window_bounds = array<i64: 128, 256>}, {transform_indices = @transform_1, window_bounds = array<i64: 256, 128>}, {pipeline_mode = #tpu.pipeline_mode<synchronous>, transform_indices = @transform_2, window_bounds = array<i64: 128, 128>}, {pipeline_mode = #tpu.pipeline_mode<synchronous>, transform_indices = @transform_3, window_bounds = array<i64: 1, 128>}, {transform_indices = @transform_4, window_bounds = array<i64: 128, 128>}]} {
    %c0_i32 = arith.constant 0 : i32
    %0 = arith.cmpi eq, %arg1, %c0_i32 : i32
    %1 = arith.extui %0 : i1 to i32
    %c0_i32_0 = arith.constant 0 : i32
    %2 = arith.cmpi ne, %1, %c0_i32_0 : i32
    scf.if %2 {
      %cst_10 = arith.constant 0.000000e+00 : f32
      %12 = vector.broadcast %cst_10 : f32 to vector<128x128xf32>
      %c0_11 = arith.constant 0 : index
      %c0_12 = arith.constant 0 : index
      %13 = vector.load %arg7[%c0_11, %c0_12] : memref<128x128xf32, #tpu.memory_space<vmem>>, vector<128x128xf32>
      tpu.vector_store %arg7[%c0_11, %c0_12], %12 {strides = array<i32>} : memref<128x128xf32, #tpu.memory_space<vmem>>, vector<128x128xf32>,
    } else {
    }
    %c0 = arith.constant 0 : index
    %c0_1 = arith.constant 0 : index
    %3 = vector.load %arg7[%c0, %c0_1] : memref<128x128xf32, #tpu.memory_space<vmem>>, vector<128x128xf32>
    %c0_2 = arith.constant 0 : index
    %c0_3 = arith.constant 0 : index
    %4 = vector.load %arg2[%c0_2, %c0_3] : memref<128x256xbf16, #tpu.memory_space<vmem>>, vector<128x256xbf16>
    %c0_4 = arith.constant 0 : index
    %c0_5 = arith.constant 0 : index
    %5 = vector.load %arg3[%c0_4, %c0_5] : memref<256x128xbf16, #tpu.memory_space<vmem>>, vector<256x128xbf16>
    %cst = arith.constant dense<0.000000e+00> : vector<128x128xf32>
    %6 = tpu.matmul %4, %5, %cst {dimension_numbers = #tpu.dot_dimension_numbers<[1], [0], [0], [1], [0, 0, 1, 1], [], []>} : vector<128x256xbf16>, vector<256x128xbf16>, vector<128x128xf32> -> vector<128x128xf32>
    %7 = arith.addf %3, %6 : vector<128x128xf32>
    %c0_6 = arith.constant 0 : index
    %c0_7 = arith.constant 0 : index
    %8 = vector.load %arg7[%c0_6, %c0_7] : memref<128x128xf32, #tpu.memory_space<vmem>>, vector<128x128xf32>
    tpu.vector_store %arg7[%c0_6, %c0_7], %7 {strides = array<i32>} : memref<128x128xf32, #tpu.memory_space<vmem>>, vector<128x128xf32>,
    %c0_i32_8 = arith.constant 0 : i32
    %9 = arith.cmpi eq, %arg1, %c0_i32_8 : i32
    %10 = arith.extui %9 : i1 to i32
    %c0_i32_9 = arith.constant 0 : i32
    %11 = arith.cmpi ne, %10, %c0_i32_9 : i32
    scf.if %11 {
      %c0_10 = arith.constant 0 : index
      %c0_11 = arith.constant 0 : index
      %12 = vector.load %arg7[%c0_10, %c0_11] : memref<128x128xf32, #tpu.memory_space<vmem>>, vector<128x128xf32>
      %13 = arith.truncf %12 : vector<128x128xf32> to vector<128x128xbf16>
      %c0_12 = arith.constant 0 : index
      %c0_13 = arith.constant 0 : index
      %14 = vector.load %arg4[%c0_12, %c0_13] : memref<128x128xbf16, #tpu.memory_space<vmem>>, vector<128x128xbf16>
      %cst_14 = arith.constant dense<0.000000e+00> : vector<128x128xf32>
      %15 = tpu.matmul %13, %14, %cst_14 {dimension_numbers = #tpu.dot_dimension_numbers<[1], [0], [0], [1], [0, 0, 1, 1], [], []>} : vector<128x128xbf16>, vector<128x128xbf16>, vector<128x128xf32> -> vector<128x128xf32>
      %c0_15 = arith.constant 0 : index
      %c0_16 = arith.constant 0 : index
      %16 = vector.load %arg5[%c0_15, %c0_16] : memref<1x128xf32, #tpu.memory_space<vmem>>, vector<1x128xf32>
      %17 = vector.broadcast %16 : vector<1x128xf32> to vector<128x128xf32>
      %18 = arith.addf %15, %17 : vector<128x128xf32>
      %cst_17 = arith.constant 0.000000e+00 : f32
      %19 = vector.broadcast %cst_17 : f32 to vector<128x128xf32>
      %20 = arith.maximumf %18, %19 : vector<128x128xf32>
      %21 = arith.truncf %20 : vector<128x128xf32> to vector<128x128xbf16>
      %c0_18 = arith.constant 0 : index
      %c0_19 = arith.constant 0 : index
      %22 = vector.load %arg6[%c0_18, %c0_19] : memref<128x128xbf16, #tpu.memory_space<vmem>>, vector<128x128xbf16>
      tpu.vector_store %arg6[%c0_18, %c0_19], %21 {strides = array<i32>} : memref<128x128xbf16, #tpu.memory_space<vmem>>, vector<128x128xbf16>,
    } else {
    }
    return
  }
  func.func @transform_0(%arg0: i32, %arg1: i32) -> (i32, i32) {
    %c0_i32 = arith.constant 0 : i32
    return %arg0, %arg1 : i32, i32
  }
  func.func @transform_1(%arg0: i32, %arg1: i32) -> (i32, i32) {
    %c0_i32 = arith.constant 0 : i32
    %c0_i32_0 = arith.constant 0 : i32
    return %arg1, %c0_i32 : i32, i32
  }
  func.func @transform_2(%arg0: i32, %arg1: i32) -> (i32, i32) {
    %c0_i32 = arith.constant 0 : i32
    %c0_i32_0 = arith.constant 0 : i32
    %c0_i32_1 = arith.constant 0 : i32
    return %c0_i32, %c0_i32_0 : i32, i32
  }
  func.func @transform_3(%arg0: i32, %arg1: i32) -> (i32, i32) {
    %c0_i32 = arith.constant 0 : i32
    %c0_i32_0 = arith.constant 0 : i32
    %c0_i32_1 = arith.constant 0 : i32
    return %c0_i32, %c0_i32_0 : i32, i32
  }
  func.func @transform_4(%arg0: i32, %arg1: i32) -> (i32, i32) {
    %c0_i32 = arith.constant 0 : i32
    %c0_i32_0 = arith.constant 0 : i32
    return %arg0, %c0_i32 : i32, i32
  }
}

</mosaic_0001>

<bundles_post_ra>
// kernel: tpu_custom_call.1
= control target key start
LH: loop header
LB: loop body
LE: loop exit
PB: predicated region body
PF: predicated region fallthrough
CT: control target
= control target key end

     0   :  { %9 = vsyncpa [#allocation4], 0  ;;  %s1963_s0 = inlined_call_operand.hbm [shape: bf16[256,256], index: 0, kind: input, shape index: {}]   ;;  %s1964_s1 = inlined_call_operand.hbm [shape: bf16[256,128], index: 1, kind: input, shape index: {}]   ;;  %s1965_s2 = inlined_call_operand.hbm [shape: bf16[128,128], index: 2, kind: input, shape index: {}]   ;;  %s1966_s3 = inlined_call_operand.vmem [shape: f32[1,128], index: 3, kind: input, shape index: {}]   ;;  %s1967_s4 = inlined_call_operand.hbm [shape: bf16[256,128], index: 4, kind: output, shape index: {}]  }
   0x1   :  { %11 = vsyncpa [#allocation4 + $0x1], 0 }
   0x2   :  { %12 = vsyncpa [#allocation7], 0 }
   0x3   :  { %13 = vsyncpa [#allocation5], 0 }
   0x4   :  { %15 = vsyncpa [#allocation5 + $0x1], 0  ;;  %s1675_s15 = smov 0   ;;  %s1677_s16 = smov 0  }
   0x5   :  { %s1679_s17 = smov 0   ;;  %s1681_s18 = smov 0  }
   0x6   :  { %s1683_s19 = smov 0   ;;  %s1685_s20 = smov 0  }
   0x7 LB: > { %s1074_s21 = sadd.s32 4294967295, %s1638_s20   ;;  %s1075_s22 = sadd.s32 4294967294, %s1638_s20   ;;  %s1638_s20 = sphi %s1685_s20, %s21_s20   ;;  %s1634_s19 = sphi %s1683_s19, %s1989_s19   ;;  %s1630_s18 = sphi %s1681_s18, %s1988_s18   ;;  %s1626_s17 = sphi %s1679_s17, %s1987_s17   ;;  %s1622_s16 = sphi %s1677_s16, %s1986_s16   ;;  %s1618_s15 = sphi %s1675_s15, %s1985_s15  }
   0x8   : > { %p55_p0 = scmp.ne.s32.totalorder %s1622_s16, %s1618_s15  ;;  %p1709_p1 = scmp.eq.s32.totalorder %s1074_s21, 0 }
   0x9   : > { %p1713_p2 = scmp.eq.s32.totalorder %s1074_s21, 1  ;;  %p153_p3 = scmp.eq.s32.totalorder %s1075_s22, 1 }
   0xa   : > { %s1972_s23 = scalar_select %p1709_p1, 1, 0 }
   0xb   : > { %p1719_p4 = por %p1709_p1, %p55_p0  ;;  %p1076_p5 = scmp.ge.s32.totalorder %s1638_s20, 1 }
   0xc   : > { %p1724_p6 = por %p153_p3, %p55_p0  ;;  %p160_p7 = scmp.lt.s32.totalorder %s1638_s20, 3 }
   0xd   : > { %s1974_s25 = scalar_select %p1719_p4, 1, 0 }
   0xe   : > { %s1975_s26 = scalar_select %p1724_p6, 1, 0 }
   0xf   : > { %p1729_p8 = pnand %p1076_p5, %p160_p7  ;;  %s1640_s28 = smov [#allocation6]  }
  0x10   : > { %s175_s29 = sshll.u32 %s1640_s28, 4  ;;  %s1641_s5 = smov [#allocation8]   ;;  %s1733_s29 = int_to_ptr.vmem [resolvable:$true] %s175_s29 }
  0x11   : > { %p1341_p9 = pneg %p1729_p8  ;;  %s188_s6 = sshll.u32 %s1641_s5, 4  ;;  %s1744_s6 = int_to_ptr.vmem [resolvable:$true] %s188_s6 }
  0x12   : > { %s1466_s9 = scalar_lea.hbm %s1964_s1, 2048 }
  0x13   : > { %p1740_p11 = pnand %p1341_p9, %p1709_p1  ;;  %p1467_p12 = scmp.ne.s32.totalorder %s1964_s1, %s1466_s9 }
  0x14   : > { %p1473_p5 = scmp.lt.u32.totalorder %s1466_s9, %s1964_s1 }
  0x15   : > { %p1468_p13 = pneg %p1740_p11 }
  0x17   : > { %p1469_p0 = pnand %p1468_p13, %p1467_p12 }
  0x19   : > { %p1470_p3 = pneg %p1469_p0 }
  0x1b   : > { %p1475_p7 = pnand %p1473_p5, %p1470_p3 }
  0x1d   : > { %1478 = shalt.err (!%p1475_p7)
}
  0x1e   : > { %s1479_s14 = scalar_lea.vmem %s1733_s29, 2048  ;;  %p1487_p1 = scmp.lt.s32.totalorder %s1733_s29, %s1733_s29 }
  0x1f   : > { %p1480_p9 = scmp.ne.s32.totalorder %s1733_s29, %s1479_s14  ;;  %p1488_p12 = scmp.lt.s32.totalorder %s1479_s14, %s1479_s14 }
  0x21   : > { %p1482_p10 = pnand %p1480_p9, %p1468_p13  ;;  %p1489_p0 = por %p1488_p12, %p1487_p1 }
  0x23   : > { %p1483_p6 = pneg %p1482_p10 }
  0x25   : > { %p1490_p4 = pnand %p1489_p0, %p1483_p6 }
  0x27   : > { %1493 = shalt.err (!%p1490_p4)
}
  0x28   : > { %s1642_s21 = smov 64   ;;  %s1643_s22 = smov 4  }
  0x29   : > { %1344 = dma.hbm_to_vmem [thread:$0]  (!%p1740_p11), %s1964_s1, 2048, %s1733_s29, [#allocation7], %s1642_s21, %s1642_s21, %s1643_s22  }
  0x2a   : > { %s1494_s9 = scalar_lea.hbm %s1965_s2, 1024 }
  0x2b   : > { %p1495_p1 = scmp.ne.s32.totalorder %s1965_s2, %s1494_s9  ;;  %p1501_p10 = scmp.lt.u32.totalorder %s1494_s9, %s1965_s2 }
  0x2d   : > { %p1497_p4 = pnand %p1495_p1, %p1468_p13 }
  0x2f   : > { %p1498_p6 = pneg %p1497_p4 }
  0x31   : > { %p1503_p3 = pnand %p1501_p10, %p1498_p6 }
  0x33   : > { %1506 = shalt.err (!%p1503_p3)
}
  0x34   : > { %s1507_s29 = scalar_lea.vmem %s1744_s6, 1024  ;;  %p1515_p12 = scmp.lt.s32.totalorder %s1744_s6, %s1744_s6 }
  0x35   : > { %p1508_p5 = scmp.ne.s32.totalorder %s1744_s6, %s1507_s29  ;;  %p1516_p0 = scmp.lt.s32.totalorder %s1507_s29, %s1507_s29 }
  0x37   : > { %p1510_p7 = pnand %p1508_p5, %p1468_p13  ;;  %p1517_p1 = por %p1516_p0, %p1515_p12 }
  0x39   : > { %p1511_p9 = pneg %p1510_p7 }
  0x3b   : > { %p1518_p4 = pnand %p1517_p1, %p1511_p9 }
  0x3d   : > { %1521 = shalt.err (!%p1518_p4)
}
  0x3e   : > { %1347 = dma.hbm_to_vmem [thread:$0]  (!%p1740_p11), %s1965_s2, 1024, %s1744_s6, [#allocation7], %s1642_s21, %s1642_s21, %s1643_s22  }
  0x3f   : > { %s33_s5 = sadd.s32 1, %s1634_s19  ;;  %s42_s7 = sadd.s32 1, %s1626_s17 }
  0x40   : > { %p35_p13 = scmp.ge.s32.totalorder %s33_s5, 2  ;;  %p49_p6 = scmp.ne.s32.totalorder %s1626_s17, %s1622_s16 }
  0x41   : > { %p50_p10 = scmp.eq.s32.totalorder %s1638_s20, 0  ;;  %p1358_p3 = scmp.lt.s32.totalorder %s1638_s20, 2 }
  0x42   : > { %s1991_s5 = smov (%p35_p13, %s33_s5), 0  ;;  %p1808_p7 = por %p1713_p2, %p49_p6 }
  0x43   : > { %p51_p5 = por %p50_p10, %p49_p6  ;;  %s37_s8 = ssub.s32 %s1634_s19, %s1991_s5 }
  0x44   : > { %s1978_s30 = scalar_select %p1808_p7, 1, 0 }
  0x45   : > { %s205_s9 = sand.u32 1, %s1626_s17   ;;  %p40_p9 = scmp.eq.s32.totalorder %s37_s8, 0 }
  0x46   : > { %s1080_s6 = sshll.u32 %s205_s9, 7  ;;  %s1152_s21 = sshll.u32 %s1634_s19, 11 }
  0x47   : > { %s1817_s22 = scalar_select %p40_p9, %s1626_s17, %s42_s7  }
  0x48   : > { %s1822_s12 = scalar_lea.hbm %s1963_s0, %s1152_s21  ;;  %s209_s24 = scalar_lea.vmem [#allocation3], %s1080_s6 }
  0x49   : > { %s219_s13 = sshll.u32 %s209_s24, 4  ;;  %p1826_p2 = pnand %p1358_p3, %p51_p5  ;;  %s1830_s13 = int_to_ptr.vmem [resolvable:$true] %s219_s13 }
  0x4a   : > { %s1832_s14 = scalar_lea.sflag [#allocation4], %s205_s9  ;;  %s1522_s28 = scalar_lea.hbm %s1822_s12, 2048 }
  0x4b   : > { %p1523_p11 = scmp.ne.s32.totalorder %s1822_s12, %s1522_s28  ;;  %p1524_p12 = pneg %p1826_p2 }
  0x4c   : > { %s1527_s6 = scalar_lea.hbm %s1963_s0, 4096  ;;  %p1528_p4 = scmp.lt.u32.totalorder %s1822_s12, %s1963_s0 }
  0x4d   : > { %p1525_p0 = pnand %p1524_p12, %p1523_p11  ;;  %p1529_p13 = scmp.lt.u32.totalorder %s1527_s6, %s1522_s28 }
  0x4e   : > { %p1531_p10 = scmp.lt.u32.totalorder %s1522_s28, %s1822_s12 }
  0x4f   : > { %p1526_p1 = pneg %p1525_p0  ;;  %p1530_p6 = por %p1529_p13, %p1528_p4 }
  0x51   : > { %p1532_p3 = por %p1531_p10, %p1530_p6 }
  0x53   : > { %p1533_p5 = pnand %p1532_p3, %p1526_p1 }
  0x55   : > { %1536 = shalt.err (!%p1533_p5)
}
  0x56   : > { %s1537_s9 = scalar_lea.vmem %s1830_s13, 2048  ;;  %s1644_s11 = smov [#allocation3]  }
  0x57   : > { %p1538_p9 = scmp.ne.s32.totalorder %s1830_s13, %s1537_s9  ;;  %s1542_s24 = sshll.u32 %s1644_s11, 4  ;;  %s1543_s24 = int_to_ptr.vmem [resolvable:$false] %s1542_s24 }
  0x58   : > { %s1544_s7 = scalar_lea.vmem %s1543_s24, 4096  ;;  %p1545_p7 = scmp.lt.s32.totalorder %s1830_s13, %s1543_s24 }
  0x59   : > { %p1540_p11 = pnand %p1538_p9, %p1524_p12  ;;  %p1546_p4 = scmp.lt.s32.totalorder %s1544_s7, %s1537_s9 }
  0x5b   : > { %p1541_p0 = pneg %p1540_p11  ;;  %p1547_p13 = por %p1546_p4, %p1545_p7 }
  0x5d   : > { %p1548_p6 = pnand %p1547_p13, %p1541_p0 }
  0x5f   : > { %1551 = shalt.err (!%p1548_p6)
}
  0x60   : > { %s1645_s28 = smov 128   ;;  %s1646_s8 = smov 8  }
  0x61   : > { %1351 = dma.hbm_to_vmem [thread:$0]  (!%p1826_p2), %s1822_s12, 2048, %s1830_s13, %s1832_s14, %s1645_s28, %s1645_s28, %s1646_s8  }
  0x62   : > { %231 = sbr.rel (%p1729_p8) target bundleno = 653 (0x28d), region = 36  ;;  %s1863_s6 = sand.u32 (!%p1729_p8), 1, %s1622_s16  }
  0x63   : > { %s1085_s21 = sshll.u32 (!%p1729_p8), %s1863_s6, 7  ;;  %s234_s10 = scalar_lea.sflag (!%p1729_p8), [#allocation4], %s1863_s6 }
  0x64   : > { %s1867_s9 = scalar_lea.vmem (!%p1729_p8), [#allocation3], %s1085_s21  ;;  %p1980_p7 = scmp.ne.s32.totalorder (!%p1729_p8), %s1974_s25, 0 }
  0x69   : > { %1605 = dma.done.wait (%p1980_p7), %s234_s10, 2048  }
  0x6a   : > { %1607 = vsyncadd (%p1980_p7), %s234_s10, 4294965248  ;;  %p1981_p2 = scmp.ne.s32.totalorder %s1972_s23, 0 }
  0x6c   : > { %1609 = dma.done.wait (%p1981_p2), [#allocation7], 3072  }
  0x6d   : > { %1611 = vsyncadd (%p1981_p2), [#allocation7], 4294964224  ;;  %v1418_v0 = vld [vmem:[#allocation6 + $0x40] sm:$0xff]   ;;  %v1420_v2 = vld [vmem:[#allocation6 + $0x48] sm:$0xff]   ;;  %s1088_s27 = sshll.u32 %s1863_s6, 6  ;;  %s1169_s29 = sshll.u32 %s1630_s18, 10 }
  0x6e   : > { %v1419_v1 = vld [vmem:[#allocation6] sm:$0xff]   ;;  %1217 = vmatprep.subr.bf16.mxu0 %v1418_v0  ;;  %v1421_v3 = vld [vmem:[#allocation6 + $0x8] sm:$0xff]   ;;  %v1422_v4 = vld [vmem:[#allocation6 + $0x50] sm:$0xff]   ;;  %s1897_s12 = scalar_lea.vmem [#allocation9], %s1088_s27  ;;  %s1912_s24 = scalar_lea.hbm %s1967_s4, %s1169_s29 }
  0x6f   : > { %1218 = vmatpush3.bf16.msra.mxu0 %v1419_v1  ;;  %v1423_v5 = vld [vmem:[#allocation6 + $0x10] sm:$0xff]   ;;  %v1424_v6 = vld [vmem:[#allocation6 + $0x58] sm:$0xff]   ;;  %v1426_v8 = vld [vmem:[#allocation6 + $0x60] sm:$0xff]   ;;  %s969_s13 = sshll.u32 %s1897_s12, 4  ;;  %s956_s7 = scalar_lea.sflag [#allocation5], %s1863_s6  ;;  %s1907_s13 = int_to_ptr.vmem [resolvable:$true] %s969_s13 }
  0x70   : > { %1219 = vmatprep.subr.bf16.mxu0 %v1420_v2  ;;  %v1425_v7 = vld [vmem:[#allocation6 + $0x18] sm:$0xff]   ;;  %v1427_v9 = vld [vmem:[#allocation6 + $0x20] sm:$0xff]   ;;  %v1428_v10 = vld [vmem:[#allocation6 + $0x68] sm:$0xff]   ;;  %s1552_s18 = scalar_lea.vmem %s1907_s13, 1024  ;;  %p1982_p12 = scmp.ne.s32.totalorder %s1978_s30, 0 }
  0x71   : > { %v1436_v11 = vld [vmem:[%s1867_s9 + $0x4] ss:$8 sps:$4 sm:$0xff]   ;;  %v1430_v13 = vld [vmem:[#allocation6 + $0x70] sm:$0xff]   ;;  %v1432_v15 = vld [vmem:[#allocation6 + $0x78] sm:$0xff]   ;;  %p1553_p8 = scmp.ne.s32.totalorder %s1907_s13, %s1552_s18  ;;  %s1647_s28 = smov [#allocation9]  }
  0x72   : > { %v1429_v12 = vld [vmem:[#allocation6 + $0x28] sm:$0xff]   ;;  %567 = vmatprep.mubr.bf16.mxu0 %v1436_v11  ;;  %v1431_v14 = vld [vmem:[#allocation6 + $0x30] sm:$0xff]   ;;  %v1433_v16 = vld [vmem:[#allocation6 + $0x38] sm:$0xff]   ;;  %s1556_s8 = sshll.u32 %s1647_s28, 4  ;;  %s1557_s8 = int_to_ptr.vmem [resolvable:$false] %s1556_s8 }
  0x73   : > { %1220 = vmatpush3.bf16.msra.mxu0 %v1421_v3  ;;  %v1458_v17 = vld [vmem:[#allocation8] sm:$0xff]   ;;  %v1459_v19 = vld [vmem:[#allocation8 + $0x8] sm:$0xff]   ;;  %v1437_v20 = vld [vmem:[%s1867_s9 + $0x14] ss:$8 sps:$4 sm:$0xff]   ;;  %p1554_p1 = pnand %p1553_p8, %p1982_p12  ;;  %s1558_s21 = scalar_lea.vmem %s1557_s8, 2048 }
  0x74   : > { %1221 = vmatprep.subr.bf16.mxu0 %v1422_v4  ;;  %v1434_v18 = vld [vmem:[%s1867_s9] ss:$8 sps:$4 sm:$0xff]   ;;  %1297 = vmatprep.subr.bf16.mxu1 %v1458_v17  ;;  %v1460_v21 = vld [vmem:[#allocation8 + $0x10] sm:$0xff]   ;;  %v1461_v22 = vld [vmem:[#allocation8 + $0x18] sm:$0xff]   ;;  %p1559_p3 = scmp.lt.s32.totalorder %s1907_s13, %s1557_s8  ;;  %p1560_p5 = scmp.lt.s32.totalorder %s1558_s21, %s1552_s18 }
  0x75   : > { %1298 = vmatpush3.bf16.msra.mxu1 %v1458_v17  ;;  %v1439_v23 = vld [vmem:[%s1867_s9 + $0x10] ss:$8 sps:$4 sm:$0xff]   ;;  %v1440_v24 = vld [vmem:[%s1867_s9 + $0x24] ss:$8 sps:$4 sm:$0xff]   ;;  %v1442_v25 = vld [vmem:[%s1867_s9 + $0x20] ss:$8 sps:$4 sm:$0xff]   ;;  %p1555_p10 = pneg %p1554_p1 }
  0x76   : > { %1299 = vmatprep.subr.bf16.mxu1 %v1459_v19  ;;  %v1443_v26 = vld [vmem:[%s1867_s9 + $0x34] ss:$8 sps:$4 sm:$0xff]   ;;  %v1445_v27 = vld [vmem:[%s1867_s9 + $0x30] ss:$8 sps:$4 sm:$0xff]   ;;  %v1446_v28 = vld [vmem:[%s1867_s9 + $0x44] ss:$8 sps:$4 sm:$0xff]   ;;  %p1561_p9 = por %p1560_p5, %p1559_p3 }
  0x77   : > { %1222 = vmatpush3.bf16.msra.mxu0 %v1423_v5  ;;  %v1448_v29 = vld [vmem:[%s1867_s9 + $0x40] ss:$8 sps:$4 sm:$0xff]   ;;  %v1449_v30 = vld [vmem:[%s1867_s9 + $0x54] ss:$8 sps:$4 sm:$0xff]   ;;  %v1451_v31 = vld [vmem:[%s1867_s9 + $0x50] ss:$8 sps:$4 sm:$0xff]  }
  0x78   : > { %1223 = vmatprep.subr.bf16.mxu0 %v1424_v6  ;;  %v1452_v32 = vld [vmem:[%s1867_s9 + $0x64] ss:$8 sps:$4 sm:$0xff]   ;;  %v1454_v33 = vld [vmem:[%s1867_s9 + $0x60] ss:$8 sps:$4 sm:$0xff]   ;;  %v1455_v34 = vld [vmem:[%s1867_s9 + $0x74] ss:$8 sps:$4 sm:$0xff]   ;;  %p1562_p11 = pnand %p1561_p9, %p1555_p10 }
  0x79   : > { %1300 = vmatpush3.bf16.msra.mxu1 %v1459_v19  ;;  %v1457_v35 = vld [vmem:[%s1867_s9 + $0x70] ss:$8 sps:$4 sm:$0xff]   ;;  %v1462_v36 = vld [vmem:[#allocation8 + $0x20] sm:$0xff]   ;;  %v1463_v37 = vld [vmem:[#allocation8 + $0x28] sm:$0xff]  }
  0x7a   : > { %1301 = vmatprep.subr.bf16.mxu1 %v1460_v21  ;;  %v1464_v38 = vld [vmem:[#allocation8 + $0x30] sm:$0xff]   ;;  %v1465_v39 = vld [vmem:[#allocation8 + $0x38] sm:$0xff]  }
  0x7b   : > { %1224 = vmatpush3.bf16.msra.mxu0 %v1425_v7 }
  0x7c   : > { %1225 = vmatprep.subr.bf16.mxu0 %v1426_v8 }
  0x7d   : > { %1302 = vmatpush3.bf16.msra.mxu1 %v1460_v21 }
  0x7e   : > { %1303 = vmatprep.subr.bf16.mxu1 %v1461_v22 }
  0x7f   : > { %1226 = vmatpush3.bf16.msra.mxu0 %v1427_v9 }
  0x80   : > { %1227 = vmatprep.subr.bf16.mxu0 %v1428_v10 }
  0x81   : > { %1304 = vmatpush3.bf16.msra.mxu1 %v1461_v22 }
  0x82   : > { %1305 = vmatprep.subr.bf16.mxu1 %v1462_v36 }
  0x83   : > { %1228 = vmatpush3.bf16.msra.mxu0 %v1429_v12 }
  0x84   : > { %1229 = vmatprep.subr.bf16.mxu0 %v1430_v13 }
  0x85   : > { %1306 = vmatpush3.bf16.msra.mxu1 %v1462_v36 }
  0x86   : > { %1307 = vmatprep.subr.bf16.mxu1 %v1463_v37 }
  0x87   : > { %1230 = vmatpush3.bf16.msra.mxu0 %v1431_v14 }
  0x88   : > { %1231 = vmatprep.subr.bf16.mxu0 %v1432_v15 }
  0x89   : > { %1308 = vmatpush3.bf16.msra.mxu1 %v1463_v37 }
  0x8a   : > { %1309 = vmatprep.subr.bf16.mxu1 %v1464_v38 }
  0x8b   : > { %1232 = vmatpush3.bf16.msra.mxu0 %v1433_v16 }
  0x8d   : > { %1310 = vmatpush3.bf16.msra.mxu1 %v1464_v38 }
  0x8e   : > { %568 = vmatmul.mubr.bf16.vlgmr.msra.gmra.mrb[0].mxu0 %v1434_v18  ;;  %1311 = vmatprep.subr.bf16.mxu1 %v1465_v39 }
  0x8f   : > { %575 = vmatprep.mubr.bf16.mxu0 %v1437_v20 }
  0x91   : > { %1312 = vmatpush3.bf16.msra.mxu1 %v1465_v39 }
  0x96   : > { %576 = vmatmul.mubr.bf16.gmra.mrb[4].mxu0 %v1439_v23 }
  0x97   : > { %583 = vmatprep.mubr.bf16.mxu0 %v1440_v24 }
  0x9e   : > { %584 = vmatmul.mubr.bf16.gmra.mrb[8].mxu0 %v1442_v25 }
  0x9f   : > { %591 = vmatprep.mubr.bf16.mxu0 %v1443_v26 }
  0xa6   : > { %592 = vmatmul.mubr.bf16.gmra.mrb[12].mxu0 %v1445_v27 }
  0xa7   : > { %599 = vmatprep.mubr.bf16.mxu0 %v1446_v28 }
  0xae   : > { %600 = vmatmul.mubr.bf16.gmra.mrb[16].mxu0 %v1448_v29 }
  0xaf   : > { %607 = vmatprep.mubr.bf16.mxu0 %v1449_v30 }
  0xb6   : > { %608 = vmatmul.mubr.bf16.gmra.mrb[20].mxu0 %v1451_v31 }
  0xb7   : > { %615 = vmatprep.mubr.bf16.mxu0 %v1452_v32  ;;  %v1121_v32 = vld [vmem:[%s1966_s3] ss:$0 sm:$0xff] }
  0xbe   : > { %616 = vmatmul.mubr.bf16.gmra.mrb[24].mxu0 %v1454_v33 }
  0xbf   : > { %623 = vmatprep.mubr.bf16.mxu0 %v1455_v34 }
  0xc6   : > { %624 = vmatmul.mubr.bf16.gmra.mrb[28].mxu0 %v1457_v35 }
 0x161   : > { %v1233_v40 = vpop.f32.mrb[0].mxu0 }
 0x162   : > { %v1234_v41 = vpop.f32.mrb[1].mxu0 }
 0x163   : > { %v1235_v42 = vadd.f32 %v1234_v41, %v1233_v40  ;;  %v1236_v43 = vpop.f32.mrb[2].mxu0 }
 0x164   : > { %v1237_v44 = vpop.f32.mrb[3].mxu0 }
 0x165   : > { %v1238_v45 = vadd.f32 %v1237_v44, %v1236_v43 }
 0x167   : > { %v683_v46 = vpack.c.bf16 %v1238_v45, %v1235_v42 }
 0x169   : > { %v1239_v47 = vpop.f32.mrb[4].mxu0  ;;  %1313 = vmatprep.mubr.bf16.mxu1 %v683_v46 }
 0x16a   : > { %v1240_v48 = vpop.f32.mrb[5].mxu0 }
 0x16b   : > { %v1241_v49 = vadd.f32 %v1240_v48, %v1239_v47  ;;  %v1242_v50 = vpop.f32.mrb[6].mxu0 }
 0x16c   : > { %v1243_v51 = vpop.f32.mrb[7].mxu0 }
 0x16d   : > { %v1244_v52 = vadd.f32 %v1243_v51, %v1242_v50 }
 0x16f   : > { %v684_v53 = vpack.c.bf16 %v1244_v52, %v1241_v49 }
 0x171   : > { %v1245_v54 = vpop.f32.mrb[8].mxu0  ;;  %1314 = vmatmul.mubr.bf16.vlgmr.msra.gmra.mrb[0].mxu1 %v684_v53 }
 0x172   : > { %v1246_v55 = vpop.f32.mrb[9].mxu0 }
 0x173   : > { %v1247_v56 = vadd.f32 %v1246_v55, %v1245_v54  ;;  %v1248_v57 = vpop.f32.mrb[10].mxu0 }
 0x174   : > { %v1249_v58 = vpop.f32.mrb[11].mxu0 }
 0x175   : > { %v1250_v59 = vadd.f32 %v1249_v58, %v1248_v57 }
 0x177   : > { %v685_v60 = vpack.c.bf16 %v1250_v59, %v1247_v56 }
 0x179   : > { %v1251_v61 = vpop.f32.mrb[12].mxu0  ;;  %1317 = vmatprep.mubr.bf16.mxu1 %v685_v60 }
 0x17a   : > { %v1252_v62 = vpop.f32.mrb[13].mxu0 }
 0x17b   : > { %v1253_v63 = vadd.f32 %v1252_v62, %v1251_v61  ;;  %v1254_v0 = vpop.f32.mrb[14].mxu0 }
 0x17c   : > { %v1255_v1 = vpop.f32.mrb[15].mxu0 }
 0x17d   : > { %v1256_v2 = vadd.f32 %v1255_v1, %v1254_v0 }
 0x17f   : > { %v686_v3 = vpack.c.bf16 %v1256_v2, %v1253_v63 }
 0x181   : > { %v1257_v4 = vpop.f32.mrb[16].mxu0  ;;  %1318 = vmatmul.mubr.bf16.gmra.mrb[4].mxu1 %v686_v3 }
 0x182   : > { %v1258_v5 = vpop.f32.mrb[17].mxu0 }
 0x183   : > { %v1259_v6 = vadd.f32 %v1258_v5, %v1257_v4  ;;  %v1260_v7 = vpop.f32.mrb[18].mxu0 }
 0x184   : > { %v1261_v8 = vpop.f32.mrb[19].mxu0 }
 0x185   : > { %v1262_v9 = vadd.f32 %v1261_v8, %v1260_v7 }
 0x187   : > { %v687_v10 = vpack.c.bf16 %v1262_v9, %v1259_v6 }
 0x189   : > { %v1263_v11 = vpop.f32.mrb[20].mxu0  ;;  %1321 = vmatprep.mubr.bf16.mxu1 %v687_v10 }
 0x18a   : > { %v1264_v12 = vpop.f32.mrb[21].mxu0 }
 0x18b   : > { %v1265_v13 = vadd.f32 %v1264_v12, %v1263_v11  ;;  %v1266_v14 = vpop.f32.mrb[22].mxu0 }
 0x18c   : > { %v1267_v15 = vpop.f32.mrb[23].mxu0 }
 0x18d   : > { %v1268_v16 = vadd.f32 %v1267_v15, %v1266_v14 }
 0x18f   : > { %v688_v17 = vpack.c.bf16 %v1268_v16, %v1265_v13 }
 0x191   : > { %v1269_v18 = vpop.f32.mrb[24].mxu0  ;;  %1322 = vmatmul.mubr.bf16.gmra.mrb[8].mxu1 %v688_v17 }
 0x192   : > { %v1270_v19 = vpop.f32.mrb[25].mxu0 }
 0x193   : > { %v1271_v20 = vadd.f32 %v1270_v19, %v1269_v18  ;;  %v1272_v21 = vpop.f32.mrb[26].mxu0 }
 0x194   : > { %v1273_v22 = vpop.f32.mrb[27].mxu0 }
 0x195   : > { %v1274_v23 = vadd.f32 %v1273_v22, %v1272_v21 }
 0x197   : > { %v689_v24 = vpack.c.bf16 %v1274_v23, %v1271_v20 }
 0x199   : > { %v1275_v25 = vpop.f32.mrb[28].mxu0  ;;  %1325 = vmatprep.mubr.bf16.mxu1 %v689_v24 }
 0x19a   : > { %v1276_v26 = vpop.f32.mrb[29].mxu0 }
 0x19b   : > { %v1277_v27 = vadd.f32 %v1276_v26, %v1275_v25  ;;  %v1278_v28 = vpop.f32.mrb[30].mxu0 }
 0x19c   : > { %v1279_v29 = vpop.f32.mrb[31].mxu0 }
 0x19d   : > { %v1280_v30 = vadd.f32 %v1279_v29, %v1278_v28 }
 0x19f   : > { %v690_v31 = vpack.c.bf16 %v1280_v30, %v1277_v27 }
 0x1a1   : > { %1326 = vmatmul.mubr.bf16.gmra.mrb[12].mxu1 %v690_v31 }
 0x244   : > { %v1315_v33 = vpop.f32.mrb[0].mxu1 }
 0x245   : > { %v805_v34 = vadd.f32 %v1315_v33, %v1121_v32  ;;  %v796_v35 = vpop.f32.mrb[1].mxu1 }
 0x246   : > { %v797_v36 = vadd.f32 %v1121_v32, %v796_v35  ;;  %v1316_v37 = vpop.f32.mrb[2].mxu1 }
 0x247   : > { %v808_v38 = vadd.f32 %v1316_v37, %v1121_v32  ;;  %v799_v39 = vpop.f32.mrb[3].mxu1  ;;  %v861_v41 = vmax.f32 %v805_v34, 0.0 }
 0x248   : > { %v800_v40 = vadd.f32 %v1121_v32, %v799_v39  ;;  %v859_v43 = vmax.f32 %v797_v36, 0.0 }
 0x249   : > { %v862_v42 = vmax.f32 %v808_v38, 0.0 }
 0x24a   : > { %v860_v44 = vmax.f32 %v800_v40, 0.0 }
 0x24b   : > { %v1178_v45 = vpack.c.bf16 %v862_v42, %v861_v41 }
 0x24c   : > { %v1173_v46 = vpack.c.bf16 %v860_v44, %v859_v43 }
 0x24d   : > { %1210 = vst [vmem:[%s1897_s12 + $0x8] sm:$0xff] %v1178_v45  }
 0x24e   : > { %1174 = vst [vmem:[%s1897_s12] sm:$0xff] %v1173_v46  }
 0x254   : > { %v1319_v47 = vpop.f32.mrb[4].mxu1 }
 0x255   : > { %v821_v48 = vadd.f32 %v1319_v47, %v1121_v32  ;;  %v812_v49 = vpop.f32.mrb[5].mxu1 }
 0x256   : > { %v813_v50 = vadd.f32 %v1121_v32, %v812_v49  ;;  %v1320_v51 = vpop.f32.mrb[6].mxu1 }
 0x257   : > { %v824_v52 = vadd.f32 %v1320_v51, %v1121_v32  ;;  %v815_v53 = vpop.f32.mrb[7].mxu1  ;;  %v865_v55 = vmax.f32 %v821_v48, 0.0 }
 0x258   : > { %v816_v54 = vadd.f32 %v1121_v32, %v815_v53  ;;  %v863_v57 = vmax.f32 %v813_v50, 0.0 }
 0x259   : > { %v866_v56 = vmax.f32 %v824_v52, 0.0 }
 0x25a   : > { %v864_v58 = vmax.f32 %v816_v54, 0.0 }
 0x25b   : > { %v1188_v59 = vpack.c.bf16 %v866_v56, %v865_v55 }
 0x25c   : > { %v1183_v60 = vpack.c.bf16 %v864_v58, %v863_v57 }
 0x25d   : > { %1212 = vst [vmem:[%s1897_s12 + $0x18] sm:$0xff] %v1188_v59  }
 0x25e   : > { %1211 = vst [vmem:[%s1897_s12 + $0x10] sm:$0xff] %v1183_v60  }
 0x264   : > { %v1323_v61 = vpop.f32.mrb[8].mxu1 }
 0x265   : > { %v837_v62 = vadd.f32 %v1323_v61, %v1121_v32  ;;  %v828_v63 = vpop.f32.mrb[9].mxu1 }
 0x266   : > { %v829_v0 = vadd.f32 %v1121_v32, %v828_v63  ;;  %v1324_v1 = vpop.f32.mrb[10].mxu1 }
 0x267   : > { %v840_v2 = vadd.f32 %v1324_v1, %v1121_v32  ;;  %v831_v3 = vpop.f32.mrb[11].mxu1  ;;  %v869_v5 = vmax.f32 %v837_v62, 0.0 }
 0x268   : > { %v832_v4 = vadd.f32 %v1121_v32, %v831_v3  ;;  %v867_v7 = vmax.f32 %v829_v0, 0.0 }
 0x269   : > { %v870_v6 = vmax.f32 %v840_v2, 0.0 }
 0x26a   : > { %v868_v8 = vmax.f32 %v832_v4, 0.0 }
 0x26b   : > { %v1198_v9 = vpack.c.bf16 %v870_v6, %v869_v5 }
 0x26c   : > { %v1193_v10 = vpack.c.bf16 %v868_v8, %v867_v7 }
 0x26d   : > { %1214 = vst [vmem:[%s1897_s12 + $0x28] sm:$0xff] %v1198_v9  }
 0x26e   : > { %1213 = vst [vmem:[%s1897_s12 + $0x20] sm:$0xff] %v1193_v10  }
 0x274   : > { %v1327_v11 = vpop.f32.mrb[12].mxu1 }
 0x275   : > { %v853_v12 = vadd.f32 %v1327_v11, %v1121_v32  ;;  %v844_v13 = vpop.f32.mrb[13].mxu1 }
 0x276   : > { %v845_v14 = vadd.f32 %v1121_v32, %v844_v13  ;;  %v1328_v15 = vpop.f32.mrb[14].mxu1 }
 0x277   : > { %v856_v16 = vadd.f32 %v1328_v15, %v1121_v32  ;;  %v847_v17 = vpop.f32.mrb[15].mxu1  ;;  %v873_v19 = vmax.f32 %v853_v12, 0.0 }
 0x278   : > { %v848_v18 = vadd.f32 %v1121_v32, %v847_v17  ;;  %v871_v21 = vmax.f32 %v845_v14, 0.0 }
 0x279   : > { %v874_v20 = vmax.f32 %v856_v16, 0.0 }
 0x27a   : > { %v872_v22 = vmax.f32 %v848_v18, 0.0 }
 0x27b   : > { %v1208_v23 = vpack.c.bf16 %v874_v20, %v873_v19 }
 0x27c   : > { %v1203_v24 = vpack.c.bf16 %v872_v22, %v871_v21 }
 0x27d   : > { %1216 = vst [vmem:[%s1897_s12 + $0x38] sm:$0xff] %v1208_v23  }
 0x27e   : > { %1215 = vst [vmem:[%s1897_s12 + $0x30] sm:$0xff] %v1203_v24  }
 0x27f   : > { %1565 = shalt.err (!%p1562_p11)
}
 0x280   : > { %s1566_s10 = scalar_lea.hbm %s1912_s24, 1024  ;;  %s1570_s25 = scalar_lea.hbm %s1967_s4, 2048 }
 0x281   : > { %p1567_p0 = scmp.ne.s32.totalorder %s1912_s24, %s1566_s10  ;;  %p1571_p6 = scmp.lt.u32.totalorder %s1912_s24, %s1967_s4 }
 0x282   : > { %p1572_p7 = scmp.lt.u32.totalorder %s1570_s25, %s1566_s10  ;;  %p1574_p8 = scmp.lt.u32.totalorder %s1566_s10, %s1912_s24 }
 0x283   : > { %p1568_p4 = pnand %p1567_p0, %p1982_p12 }
 0x284   : > { %p1573_p2 = por %p1572_p7, %p1571_p6 }
 0x285   : > { %p1569_p13 = pneg %p1568_p4 }
 0x286   : > { %p1575_p1 = por %p1574_p8, %p1573_p2 }
 0x288   : > { %p1576_p10 = pnand %p1575_p1, %p1569_p13 }
 0x28a   : > { %1579 = shalt.err (!%p1576_p10)
}
 0x28b   : > { %s1648_s29 = smov 64   ;;  %s1649_s14 = smov 4  }
 0x28c   : > { %1339 = dma.vmem_to_hbm [thread:$0]  (%p1982_p12), %s1907_s13, 1024, %s1912_s24, %s956_s7, %s1648_s29, %s1648_s29, %s1649_s14  }
 0x28d PF: > { %s984_s11 = sand.u32 1, %s1618_s15   ;;  %p1983_p3 = scmp.ne.s32.totalorder %s1975_s26, 0 }
 0x28e   : > { %p1984_p5 = scmp.ge.s32.totalorder %s1638_s20, 2  ;;  %s985_s18 = scalar_lea.sflag [#allocation5], %s984_s11 }
 0x290   : > { %p1353_p9 = pnand %p1984_p5, %p1983_p3 }
 0x292   : > { %1613 = dma.done.wait (!%p1353_p9), %s985_s18, 1024  }
 0x293   : > { %1615 = vsyncadd (!%p1353_p9), %s985_s18, 4294966272  ;;  %s21_s20 = sadd.s32 1, %s1638_s20   ;;  %s1985_s15 = smov %s1622_s16 }
 0x294   : > { %p18_p11 = scmp.ge.s32.totalorder %s21_s20, 4   ;;  %s1986_s16 = smov %s1626_s17 }
 0x295   : > { %s1987_s17 = smov %s1817_s22  ;;  %s1988_s18 = smov %s1634_s19 }
 0x296   : > { %s1989_s19 = smov %s1991_s5  ;;  %20 = sbr.rel (!%p18_p11) target bundleno = 7 (0x7), region = 98 }
 0x29d   :  { %990 = vsyncpa [#allocation4], 1 }
 0x29e   :  { %992 = vsyncpa [#allocation4 + $0x1], 1 }
 0x29f   :  { %993 = vsyncpa [#allocation7], 1 }
 0x2a0   :  { %994 = vsyncpa [#allocation5], 1 }
 0x2a1   :  { %996 = vsyncpa [#allocation5 + $0x1], 1 }

</bundles_post_ra>
